<compile_context>
chip_gen: v7x
topology: tpu7x:2x2x1
jax: 0.10.0
libtpu: 0.0.40
codegen_flags: <defaults>
</compile_context>

<pallas_src>
import functools

import jax
import jax.numpy as jnp
from jax.experimental import pallas as pl
from jax.experimental.pallas import tpu as pltpu

_LANE = 128
_SUB = 8


def _identity(x):
    # default activation of FCN3Network (linear_activation)
    return x


def _round_up(n, m):
    return ((n + m - 1) // m) * m


# ---------------------------------------------------------------------------
# Kernels (feature-major: batch on the 128-lane axis)
# ---------------------------------------------------------------------------

def fcn3_fused_kernel(xt_ref, w1_ref, b1_ref, w2_ref, b2_ref, w3_ref, b3_ref,
                      o_ref, *, act1=_identity, act2=_identity):
    """One batch tile of the fused 3-layer MLP (feature-major).

    xt_ref: (D,  TB)  input tile, batch on lanes (already in compute dtype)
    w1_ref: (H1, D)   resident, compute dtype (bf16 or f32), PyTorch layout
    b1_ref: (H1, 1)   resident, f32
    w2_ref: (H2, H1)  resident, compute dtype
    b2_ref: (H2, 1)   resident, f32
    w3_ref: (H2, 1)   resident, f32 column (width-1 layer stays off the MXU)
    b3_ref: (1,)      SMEM scalar, f32
    o_ref : (1,  TB)  lane-dense output tile
    """
    cdt = w1_ref.dtype
    xt = xt_ref[...].astype(cdt)                     # no-op when streamed in cdt

    # fc1 (MXU, f32 accumulate) + bias/activation in f32 (VPU)
    h1 = jnp.dot(w1_ref[...], xt, preferred_element_type=jnp.float32) + b1_ref[...]
    a1 = act1(h1)

    # fc2 (MXU, f32 accumulate) + bias/activation in f32
    h2 = jnp.dot(w2_ref[...], a1.astype(cdt),
                 preferred_element_type=jnp.float32) + b2_ref[...]
    a2 = act2(h2)

    # fc3 (output width 1): broadcast-mul + sublane reduce on VPU/XLU.
    out = jnp.sum(a2 * w3_ref[...], axis=0, keepdims=True) + b3_ref[0]
    o_ref[...] = out.astype(o_ref.dtype)


def fcn3_folded_kernel(xt_ref, v_ref, c_ref, o_ref):
    """Identity-activation fast path: out = v . x + c (pure HBM streaming).

    xt_ref: (D, TB) input tile
    v_ref : (D, 1)  folded weight column (f32), resident
    c_ref : (1,)    folded bias, SMEM scalar (f32)
    o_ref : (1, TB) lane-dense output tile
    """
    xt = xt_ref[...].astype(jnp.float32)
    out = jnp.sum(xt * v_ref[...], axis=0, keepdims=True) + c_ref[0]
    o_ref[...] = out.astype(o_ref.dtype)


# ---------------------------------------------------------------------------
# Parameter preparation (one-time)
# ---------------------------------------------------------------------------

def prepare_fcn3_params(w1, b1, w2, b2, w3, b3, *, compute_dtype=jnp.bfloat16):
    """Weights keep the PyTorch (out, in) layout; fc1/fc2 cast to the MXU
    compute dtype, biases / output row stay f32.  Also precomputes the folded
    affine map used by the identity-activation fast path."""
    w1 = jnp.asarray(w1, jnp.float32)
    b1 = jnp.asarray(b1, jnp.float32).reshape(-1)
    w2 = jnp.asarray(w2, jnp.float32)
    b2 = jnp.asarray(b2, jnp.float32).reshape(-1)
    w3 = jnp.asarray(w3, jnp.float32).reshape(1, -1)
    b3 = jnp.asarray(b3, jnp.float32).reshape(-1)
    H1, D = w1.shape
    H2 = w2.shape[0]
    assert w2.shape == (H2, H1) and w3.shape == (1, H2)
    assert b1.shape == (H1,) and b2.shape == (H2,) and b3.shape == (1,)

    # Folded single affine map (valid only when both activations are identity).
    v_row = w3 @ w2 @ w1                                                  # (1, D)
    c_fold = (w3 @ (w2 @ b1.reshape(H1, 1) + b2.reshape(H2, 1))).reshape(1) + b3

    return dict(
        w1=w1.astype(compute_dtype),        # (H1, D)
        b1=b1.reshape(H1, 1),               # (H1, 1) f32
        w2=w2.astype(compute_dtype),        # (H2, H1)
        b2=b2.reshape(H2, 1),               # (H2, 1) f32
        w3=w3.reshape(H2, 1),               # (H2, 1) f32 column
        b3=b3,                              # (1,)    f32
        v_fold=v_row.reshape(D, 1),         # (D, 1)  f32
        c_fold=c_fold,                      # (1,)    f32
    )


# ---------------------------------------------------------------------------
# Forward wrapper
# ---------------------------------------------------------------------------

def _vmem_cap_bytes():
    """Generation-aware VMEM budget (~half of physical VMEM)."""
    try:
        cap = int(pltpu.get_tpu_info().vmem_capacity_bytes)
        return max(16 * 2**20, cap // 2)       # 32 MiB on v7x, 64 MiB on v5e/v6e
    except Exception:
        return 32 * 2**20                      # safe on all generations


def fcn3_forward(x, params, *, block_cols=8192, act1=_identity, act2=_identity,
                 fold_identity=True):
    """x: (B, D) -> (B, 1).  `params` from prepare_fcn3_params()."""
    B, D = x.shape
    w1, b1 = params["w1"], params["b1"]
    w2, b2 = params["w2"], params["b2"]
    w3, b3 = params["w3"], params["b3"]
    H1 = w1.shape[0]
    H2 = w2.shape[0]
    assert w1.shape == (H1, D) and w2.shape == (H2, H1)
    assert b1.shape == (H1, 1) and b2.shape == (H2, 1)
    assert w3.shape == (H2, 1) and b3.shape == (1,)

    use_fold = fold_identity and act1 is _identity and act2 is _identity

    # Feature-major input stream (layout-only wrapper transpose). Cast to the
    # MXU compute dtype at the producer so the kernel does no per-tile cast and
    # bf16 halves the dominant HBM read traffic on the fused path.
    xt = x.T
    if not use_fold and xt.dtype != w1.dtype:
        xt = xt.astype(w1.dtype)
    x_item = jnp.dtype(xt.dtype).itemsize

    # ---- padding-aware VMEM budget & tile selection ------------------------
    cap = _vmem_cap_bytes()
    d_pad = _round_up(D, _SUB)
    h_pad = _round_up(max(H1, H2), _SUB)
    if use_fold:
        per_col = (2 * d_pad * x_item        # x tile, double-buffered
                   + 2 * _SUB * 4            # out tile (1 row pads to 8 sublanes)
                   + 2 * d_pad * 4)          # f32 product intermediate
        fixed = d_pad * _LANE * 4 + (1 << 20)
    else:
        w_item = jnp.dtype(w1.dtype).itemsize
        per_col = (2 * d_pad * x_item        # x tile, double-buffered
                   + 2 * _SUB * 4            # out tile
                   + 4 * h_pad * 4)          # h1/a1/h2/a2 f32 intermediates
        fixed = (2 * (_round_up(H1, _SUB) * _round_up(D, _LANE)
                      + _round_up(H2, _SUB) * _round_up(H1, _LANE)) * w_item
                 + 8 * h_pad * _LANE * 4 + (1 << 20))   # biases, w3 col, slack
    per_col = int(per_col * 1.25) + 1        # headroom for compiler temporaries

    max_tb = max(_LANE, ((cap - fixed) // per_col) // _LANE * _LANE)
    if B <= min(block_cols, max_tb):
        TB = B                               # single tile: block == full dim is legal
    else:
        TB = max(_LANE, (min(block_cols, max_tb) // _LANE) * _LANE)
    grid = (pl.cdiv(B, TB),)
    vmem_limit = int(min(cap, max(16 * 2**20, fixed + per_col * TB)))

    x_spec = pl.BlockSpec((D, TB), lambda i: (0, i))
    out_spec = pl.BlockSpec((1, TB), lambda i: (0, i))
    resident = lambda shape: pl.BlockSpec(shape, lambda i, _n=len(shape): (0,) * _n)
    smem_scalar = pl.BlockSpec(memory_space=pltpu.MemorySpace.SMEM)
    cparams = pltpu.CompilerParams(
        dimension_semantics=("parallel",),
        vmem_limit_bytes=vmem_limit,
    )

    if use_fold:
        out = pl.pallas_call(
            fcn3_folded_kernel,
            out_shape=jax.ShapeDtypeStruct((1, B), x.dtype),
            grid=grid,
            in_specs=[x_spec, resident((D, 1)), smem_scalar],
            out_specs=out_spec,
            compiler_params=cparams,
        )(xt, params["v_fold"], params["c_fold"])
    else:
        kernel = functools.partial(fcn3_fused_kernel, act1=act1, act2=act2)
        out = pl.pallas_call(
            kernel,
            out_shape=jax.ShapeDtypeStruct((1, B), x.dtype),
            grid=grid,
            in_specs=[
                x_spec,
                resident((H1, D)),    # w1
                resident((H1, 1)),    # b1
                resident((H2, H1)),   # w2
                resident((H2, 1)),    # b2
                resident((H2, 1)),    # w3 column
                smem_scalar,          # b3 scalar
            ],
            out_specs=out_spec,
            compiler_params=cparams,
        )(xt, w1, b1, w2, b2, w3, b3)

    return out.reshape(B, 1)


# ---------------------------------------------------------------------------
# Pure-JAX reference (PyTorch layouts, kernel-matching dtype policy)
# ---------------------------------------------------------------------------

def fcn3_reference(x, w1, b1, w2, b2, w3, b3, *, compute_dtype=jnp.float32,
                   act1=_identity, act2=_identity):
    cdt = compute_dtype
    h1 = jnp.dot(x.astype(cdt), w1.T.astype(cdt),
                 preferred_element_type=jnp.float32) + b1.astype(jnp.float32)
    a1 = act1(h1)
    h2 = jnp.dot(a1.astype(cdt), w2.T.astype(cdt),
                 preferred_element_type=jnp.float32) + b2.astype(jnp.float32)
    a2 = act2(h2)
    w3_row = jnp.asarray(w3, jnp.float32).reshape(1, -1)
    return jnp.dot(a2, w3_row.T) + jnp.asarray(b3, jnp.float32).reshape(1,)


if __name__ == "__main__":
    key = jax.random.PRNGKey(0)
    kx, k1, k2, k3 = jax.random.split(key, 4)

    D, H1, H2 = 16, 32, 32
    B = 256

    # PyTorch nn.Linear convention: weight (out, in).  Gaussian weights (as in
    # _reset_with_weight_sigma with sigma=1), zero biases.
    w1 = jax.random.normal(k1, (H1, D), dtype=jnp.float32)
    b1 = jnp.zeros((H1,), jnp.float32)
    w2 = jax.random.normal(k2, (H2, H1), dtype=jnp.float32)
    b2 = jnp.zeros((H2,), jnp.float32)
    w3 = jax.random.normal(k3, (1, H2), dtype=jnp.float32)
    b3 = jnp.zeros((1,), jnp.float32)

    x = jax.random.normal(kx, (B, D), dtype=jnp.float32)

    # ---- check 1: default identity activations -> folded streaming kernel ----
    params_f32 = prepare_fcn3_params(w1, b1, w2, b2, w3, b3,
                                     compute_dtype=jnp.float32)
    out = jax.block_until_ready(fcn3_forward(x, params_f32, block_cols=128))
    ref = fcn3_reference(x, w1, b1, w2, b2, w3, b3, compute_dtype=jnp.float32)
    assert out.shape == (B, 1), out.shape
    assert jnp.allclose(out, ref, atol=2e-3, rtol=2e-4), (
        f"folded path mismatch, max abs err {float(jnp.max(jnp.abs(out - ref)))}")

    # ---- check 2: fused 3-layer path, f32, identity acts (fold disabled) -----
    out = jax.block_until_ready(
        fcn3_forward(x, params_f32, block_cols=128, fold_identity=False))
    assert out.shape == (B, 1), out.shape
    assert jnp.allclose(out, ref, atol=1e-3, rtol=1e-4), (
        f"fused f32 mismatch, max abs err {float(jnp.max(jnp.abs(out - ref)))}")

    # ---- check 3: fused path, bf16 MXU compute, nonlinear activation ---------
    params_bf16 = prepare_fcn3_params(w1, b1, w2, b2, w3, b3,
                                      compute_dtype=jnp.bfloat16)
    out = jax.block_until_ready(
        fcn3_forward(x, params_bf16, block_cols=128, act1=jnp.tanh))
    ref = fcn3_reference(x, w1, b1, w2, b2, w3, b3,
                         compute_dtype=jnp.bfloat16, act1=jnp.tanh)
    assert out.shape == (B, 1), out.shape
    assert jnp.allclose(out, ref, atol=5e-2, rtol=5e-2), (
        f"bf16 mismatch, max abs err {float(jnp.max(jnp.abs(out - ref)))}")

    print("KERNEL_OK")
</pallas_src>

<mosaic_0001>
module attributes {stable_mosaic.version = 11 : i64} {
  func.func @fcn3_folded_kernel(%arg0: i32, %arg1: memref<16x128xf32, #tpu.memory_space<vmem>>, %arg2: memref<16x1xf32, #tpu.memory_space<vmem>>, %arg3: memref<1xf32, #tpu.memory_space<smem>>, %arg4: memref<1x128xf32, #tpu.memory_space<vmem>>) attributes {dimension_semantics = [#tpu.dimension_semantics<parallel>], iteration_bounds = array<i64: 2>, scalar_prefetch = 0 : i64, scratch_operands = 0 : i64, tpu.core_type = #tpu.core_type<tc>, window_params = [{transform_indices = @transform_0, window_bounds = array<i64: 16, 128>}, {pipeline_mode = #tpu.pipeline_mode<synchronous>, transform_indices = @transform_1, window_bounds = array<i64: 16, 1>}, {transform_indices = @transform_2, window_bounds = array<i64: 1>}, {transform_indices = @transform_3, window_bounds = array<i64: 1, 128>}]} {
    %c0 = arith.constant 0 : index
    %c0_0 = arith.constant 0 : index
    %0 = vector.load %arg1[%c0, %c0_0] : memref<16x128xf32, #tpu.memory_space<vmem>>, vector<16x128xf32>
    %c0_1 = arith.constant 0 : index
    %c0_2 = arith.constant 0 : index
    %1 = vector.load %arg2[%c0_1, %c0_2] : memref<16x1xf32, #tpu.memory_space<vmem>>, vector<16x1xf32>
    %2 = vector.broadcast %1 : vector<16x1xf32> to vector<16x128xf32>
    %3 = arith.mulf %0, %2 : vector<16x128xf32>
    %cst = arith.constant dense<0.000000e+00> : vector<128xf32>
    %4 = vector.multi_reduction <add>, %3, %cst [0] : vector<16x128xf32> to vector<128xf32>
    %5 = vector.shape_cast %4 : vector<128xf32> to vector<1x128xf32>
    %c0_3 = arith.constant 0 : index
    %6 = memref.load %arg3[%c0_3] : memref<1xf32, #tpu.memory_space<smem>>
    %7 = vector.broadcast %6 : f32 to vector<1x128xf32>
    %8 = arith.addf %5, %7 : vector<1x128xf32>
    %c0_4 = arith.constant 0 : index
    %c0_5 = arith.constant 0 : index
    %9 = vector.load %arg4[%c0_4, %c0_5] : memref<1x128xf32, #tpu.memory_space<vmem>>, vector<1x128xf32>
    tpu.vector_store %arg4[%c0_4, %c0_5], %8 {strides = array<i32>} : memref<1x128xf32, #tpu.memory_space<vmem>>, vector<1x128xf32>,
    return
  }
  func.func @transform_0(%arg0: i32) -> (i32, i32) {
    %c0_i32 = arith.constant 0 : i32
    %c0_i32_0 = arith.constant 0 : i32
    return %c0_i32, %arg0 : i32, i32
  }
  func.func @transform_1(%arg0: i32) -> (i32, i32) {
    %c0_i32 = arith.constant 0 : i32
    %c0_i32_0 = arith.constant 0 : i32
    %c0_i32_1 = arith.constant 0 : i32
    return %c0_i32, %c0_i32_0 : i32, i32
  }
  func.func @transform_2(%arg0: i32) -> i32 {
    %c0_i32 = arith.constant 0 : i32
    %c0_i32_0 = arith.constant 0 : i32
    return %c0_i32 : i32
  }
  func.func @transform_3(%arg0: i32) -> (i32, i32) {
    %c0_i32 = arith.constant 0 : i32
    %c0_i32_0 = arith.constant 0 : i32
    return %c0_i32, %arg0 : i32, i32
  }
}

</mosaic_0001>

<bundles_post_ra>
// kernel: tpu_custom_call.1
= control target key start
LH: loop header
LB: loop body
LE: loop exit
PB: predicated region body
PF: predicated region fallthrough
CT: control target
= control target key end

     0   :  { %s651_s0 = inlined_call_operand.hbm [shape: f32[16,256], index: 0, kind: input, shape index: {}]   ;;  %s652_s1 = inlined_call_operand.vmem [shape: f32[16,1], index: 1, kind: input, shape index: {}]   ;;  %s653_s2 = inlined_call_operand.<no memory space> [shape: f32[1], index: 2, kind: input, shape index: {}]   ;;  %s654_s3 = inlined_call_operand.hbm [shape: f32[1,256], index: 3, kind: output, shape index: {}]  }
   0x1   :  { %8 = sst [smem:[#allocation2]] %s653_s2 }
   0x2   :  { %9 = vsyncpa [#allocation4], 0 }
   0x3   :  { %11 = vsyncpa [#allocation4 + $0x1], 0 }
   0x4   :  { %12 = vsyncpa [#allocation5], 0 }
   0x5   :  { %14 = vsyncpa [#allocation5 + $0x1], 0  ;;  %s482_s14 = smov 0   ;;  %s484_s15 = smov 0  }
   0x6   :  { %s486_s16 = smov 0   ;;  %s488_s17 = smov 0  }
   0x7 LB: > { %s503_s2 = sadd.s32 4294967295, %s451_s17   ;;  %s294_s18 = sadd.s32 4294967294, %s451_s17   ;;  %s451_s17 = sphi %s488_s17, %s668_s17   ;;  %s447_s16 = sphi %s486_s16, %s667_s16   ;;  %s443_s15 = sphi %s484_s15, %s666_s15   ;;  %s439_s14 = sphi %s482_s14, %s665_s14  }
   0x8   : > { %s507_s19 = sadd.s32 1, %s451_s17   ;;  %s27_s20 = sadd.s32 1, %s447_s16 }
   0x9   : > { %s24_s21 = ssub.s32 %s451_s17, %s507_s19  ;;  %p34_p0 = scmp.ne.s32.totalorder %s447_s16, %s443_s15 }
   0xa   : > { %p25_p1 = scmp.eq.s32.totalorder %s24_s21, 0  ;;  %p35_p2 = scmp.eq.s32.totalorder %s451_s17, 0 }
   0xb   : > { %p40_p3 = scmp.ne.s32.totalorder %s443_s15, %s439_s14  ;;  %p41_p4 = scmp.eq.s32.totalorder %s503_s2, 0 }
   0xc   : > { %s519_s22 = scalar_select %p25_p1, %s447_s16, %s27_s20  }
   0xd   : > { %p521_p5 = por %p35_p2, %p34_p0  ;;  %p525_p6 = por %p41_p4, %p40_p3 }
   0xe   : > { %p106_p7 = scmp.eq.s32.totalorder %s503_s2, 1  ;;  %p112_p8 = scmp.eq.s32.totalorder %s294_s18, 1 }
   0xf   : > { %p316_p10 = scmp.lt.s32.totalorder %s451_s17, 2  ;;  %s138_s27 = sand.u32 1, %s447_s16  }
  0x10   : > { %p532_p11 = por %p106_p7, %p34_p0  ;;  %p536_p12 = por %p112_p8, %p40_p3 }
  0x11   : > { %s298_s28 = sshll.u32 %s451_s17, 7  ;;  %s297_s29 = sshll.u32 %s138_s27, 4 }
  0x12   : > { %s658_s25 = scalar_select %p532_p11, 1, 0 }
  0x13   : > { %s659_s26 = scalar_select %p536_p12, 1, 0 }
  0x14   : > { %s545_s5 = scalar_lea.hbm %s651_s0, %s298_s28  ;;  %s142_s6 = scalar_lea.vmem [#allocation3], %s297_s29 }
  0x15   : > { %s148_s7 = sshll.u32 %s142_s6, 4  ;;  %p549_p13 = pnand %p316_p10, %p521_p5  ;;  %s553_s7 = int_to_ptr.vmem [resolvable:$true] %s148_s7 }
  0x16   : > { %s556_s9 = scalar_lea.sflag [#allocation4], %s138_s27  ;;  %s355_s10 = scalar_lea.hbm %s545_s5, 256 }
  0x17   : > { %p356_p1 = scmp.ne.s32.totalorder %s545_s5, %s355_s10  ;;  %p357_p2 = pneg %p549_p13 }
  0x18   : > { %s360_s13 = scalar_lea.hbm %s651_s0, 512  ;;  %p361_p5 = scmp.lt.u32.totalorder %s545_s5, %s651_s0 }
  0x19   : > { %p358_p3 = pnand %p357_p2, %p356_p1  ;;  %p362_p7 = scmp.lt.u32.totalorder %s360_s13, %s355_s10 }
  0x1a   : > { %p364_p10 = scmp.lt.u32.totalorder %s355_s10, %s545_s5 }
  0x1b   : > { %p359_p4 = pneg %p358_p3  ;;  %p363_p8 = por %p362_p7, %p361_p5 }
  0x1d   : > { %p365_p9 = por %p364_p10, %p363_p8 }
  0x1f   : > { %p366_p0 = pnand %p365_p9, %p359_p4 }
  0x21   : > { %369 = shalt.err (!%p366_p0)
}
  0x22   : > { %s370_s21 = scalar_lea.vmem %s553_s7, 256  ;;  %s453_s23 = smov [#allocation3]  }
  0x23   : > { %p371_p1 = scmp.ne.s32.totalorder %s553_s7, %s370_s21  ;;  %s375_s27 = sshll.u32 %s453_s23, 4  ;;  %s376_s27 = int_to_ptr.vmem [resolvable:$false] %s375_s27 }
  0x24   : > { %s377_s28 = scalar_lea.vmem %s376_s27, 512  ;;  %p378_p11 = scmp.lt.s32.totalorder %s553_s7, %s376_s27 }
  0x25   : > { %p373_p3 = pnand %p371_p1, %p357_p2  ;;  %p379_p5 = scmp.lt.s32.totalorder %s377_s28, %s370_s21 }
  0x27   : > { %p374_p12 = pneg %p373_p3  ;;  %p380_p7 = por %p379_p5, %p378_p11 }
  0x29   : > { %p381_p8 = pnand %p380_p7, %p374_p12 }
  0x2b   : > { %384 = shalt.err (!%p381_p8)
}
  0x2c   : > { %s454_s29 = smov 256   ;;  %s455_s30 = smov 128  }
  0x2d   : > { %s456_s4 = smov 8   ;;  %p156_p9 = scmp.lt.s32.totalorder %s451_s17, 3 }
  0x2e   : > { %311 = dma.hbm_to_vmem [thread:$0]  (!%p549_p13), %s545_s5, 256, %s553_s7, %s556_s9, %s454_s29, %s455_s30, %s456_s4  }
  0x2f   : > { %p661_p0 = scmp.ge.s32.totalorder %s451_s17, 1 }
  0x31   : > { %p157_p2 = pnand %p661_p0, %p156_p9 }
  0x32   : > { %s588_s6 = sand.u32 (!%p157_p2), 1, %s443_s15  }
  0x33   : > { %160 = sbr.rel (%p157_p2) target bundleno = 225 (0xe1), region = 32  ;;  %s300_s10 = sshll.u32 (!%p157_p2), %s588_s6, 4 }
  0x34   : > { %s163_s11 = scalar_lea.sflag (!%p157_p2), [#allocation4], %s588_s6  ;;  %s166_s12 = scalar_lea.vmem (!%p157_p2), [#allocation3], %s300_s10 }
  0x3a   : > { %430 = dma.done.wait (%p525_p6), %s163_s11, 256  }
  0x3b   : > { %432 = vsyncadd (%p525_p6), %s163_s11, 4294967040  ;;  %v457_v0 = vmov 0   ;;  %v190_v1 = vld [vmem:[%s652_s1] sm:$0xff]  ;;  %v191_v2 = vld [vmem:[%s652_s1 + $0x8] sm:$0xff]  ;;  %s211_s24 = sld [smem:[#allocation2]]  ;;  %s301_s13 = sshll.u32 %s503_s2, 4 }
  0x3c   : > { %354 = vset.pattern.permute.xlu0 %v457_v0  ;;  %v188_v4 = vld [vmem:[%s166_s12] sm:$0xff]  ;;  %v189_v5 = vld [vmem:[%s166_s12 + $0x8] sm:$0xff]  ;;  %s187_s18 = scalar_lea.vmem [#allocation6], %s588_s6  ;;  %s607_s27 = scalar_lea.hbm %s654_s3, %s301_s13 }
  0x3d   : > { %194 = vperm.xlu0 %354, %v190_v1   ;;  %s228_s20 = sshll.u32 %s187_s18, 4  ;;  %s216_s28 = scalar_lea.sflag [#allocation5], %s588_s6  ;;  %s609_s20 = int_to_ptr.vmem [resolvable:$true] %s228_s20 }
  0x3e   : > { %s385_s29 = scalar_lea.vmem %s609_s20, 16  ;;  %p662_p11 = scmp.ne.s32.totalorder %s658_s25, 0 }
  0x3f   : > { %p386_p6 = scmp.ne.s32.totalorder %s609_s20, %s385_s29  ;;  %s458_s2 = smov [#allocation6]  }
  0x40   : > { %s389_s30 = sshll.u32 %s458_s2, 4  ;;  %s390_s30 = int_to_ptr.vmem [resolvable:$false] %s389_s30 }
  0x41   : > { %199 = vperm.xlu0 %354, %v191_v2   ;;  %v212_v15 = vstv %s211_s24  ;;  %p387_p12 = pnand %p386_p6, %p662_p11  ;;  %s391_s4 = scalar_lea.vmem %s390_s30, 32 }
  0x42   : > { %p392_p4 = scmp.lt.s32.totalorder %s609_s20, %s390_s30  ;;  %p393_p10 = scmp.lt.s32.totalorder %s391_s4, %s385_s29 }
  0x43   : > { %p388_p13 = pneg %p387_p12 }
  0x44   : > { %p394_p1 = por %p393_p10, %p392_p4 }
  0x46   : > { %p395_p3 = pnand %p394_p1, %p388_p13 }
  0xbc   : > { %v195_v3 = vpop.permute.xlu0 %194 }
  0xbd   : > { %v202_v7 = vmul.f32 %v195_v3, %v188_v4 }
  0xc0   : > { %v200_v6 = vpop.permute.xlu0 %199 }
  0xc1   : > { %v203_v8 = vmul.f32 %v200_v6, %v189_v5 }
  0xc3   : > { %v204_v9 = vadd.f32 %v203_v8, %v202_v7 }
  0xc5   : > { %v205_v10 = vrot.slane %v204_v9, 4 }
  0xc7   : > { %v206_v11 = vadd.f32 %v205_v10, %v204_v9 }
  0xc9   : > { %v207_v12 = vrot.slane %v206_v11, 2 }
  0xcb   : > { %v208_v13 = vadd.f32 %v207_v12, %v206_v11 }
  0xcd   : > { %v209_v14 = vrot.slane %v208_v13, 1 }
  0xcf   : > { %v210_v16 = vadd.f32 %v209_v14, %v208_v13 }
  0xd1   : > { %v213_v17 = vadd.f32 %v212_v15, %v210_v16 }
  0xd3   : > { %214 = vst [vmem:[%s187_s18] sm:$0x1] %v213_v17 }
  0xd4   : > { %398 = shalt.err (!%p395_p3)
}
  0xd5   : > { %s399_s6 = scalar_lea.hbm %s607_s27, 16  ;;  %s403_s12 = scalar_lea.hbm %s654_s3, 32 }
  0xd6   : > { %p400_p5 = scmp.ne.s32.totalorder %s607_s27, %s399_s6  ;;  %p404_p9 = scmp.lt.u32.totalorder %s607_s27, %s654_s3 }
  0xd7   : > { %p405_p0 = scmp.lt.u32.totalorder %s403_s12, %s399_s6  ;;  %p407_p6 = scmp.lt.u32.totalorder %s399_s6, %s607_s27 }
  0xd8   : > { %p401_p7 = pnand %p400_p5, %p662_p11 }
  0xd9   : > { %p406_p2 = por %p405_p0, %p404_p9 }
  0xda   : > { %p402_p8 = pneg %p401_p7 }
  0xdb   : > { %p408_p12 = por %p407_p6, %p406_p2 }
  0xdd   : > { %p409_p13 = pnand %p408_p12, %p402_p8 }
  0xdf   : > { %412 = shalt.err (!%p409_p13)
}
  0xe0   : > { %306 = dma.vmem_to_hbm [thread:$0]  (%p662_p11), %s609_s20, 16, %s607_s27, %s216_s28  }
  0xe1 PF: > { %s240_s8 = sand.u32 1, %s439_s14   ;;  %p663_p4 = scmp.ne.s32.totalorder %s659_s26, 0 }
  0xe2   : > { %p664_p10 = scmp.ge.s32.totalorder %s451_s17, 2  ;;  %s241_s9 = scalar_lea.sflag [#allocation5], %s240_s8 }
  0xe4   : > { %p313_p1 = pnand %p664_p10, %p663_p4 }
  0xe6   : > { %434 = dma.done.wait (!%p313_p1), %s241_s9, 16  }
  0xe7   : > { %436 = vsyncadd (!%p313_p1), %s241_s9, 4294967280  ;;  %p17_p3 = scmp.ge.s32.totalorder %s507_s19, 4   ;;  %s665_s14 = smov %s443_s15 }
  0xe8   : > { %s666_s15 = smov %s447_s16  ;;  %s667_s16 = smov %s519_s22 }
  0xe9   : > { %s668_s17 = smov %s507_s19  ;;  %19 = sbr.rel (!%p17_p3) target bundleno = 7 (0x7), region = 77 }
  0xf0   :  { %245 = vsyncpa [#allocation4], 1 }
  0xf1   :  { %247 = vsyncpa [#allocation4 + $0x1], 1 }
  0xf2   :  { %248 = vsyncpa [#allocation5], 1 }
  0xf3   :  { %250 = vsyncpa [#allocation5 + $0x1], 1 }

</bundles_post_ra>
